<compile_context>
chip_gen: v5e
topology: v5e:2x2
jax: 0.10.0
libtpu: 0.0.40
codegen_flags: <defaults>
</compile_context>

<pallas_src>
import functools

import jax
import jax.numpy as jnp
from jax.experimental import pallas as pl
from jax.experimental.pallas import tpu as pltpu

LANES = 128          # TPU lane width; last dim of the 2-D slab
SUBLANES = 8         # f32 sublane count; accumulator is one (8, 128) vreg
NUM_CORES = 2        # leading "parallel" grid axis (sharded across v7x's 2 TCs)
TARGET_BLOCK_BYTES = 4 * 1024 * 1024   # ~4 MiB input block, double-buffered
PALLAS_MIN_ELEMS = 64 * 1024           # below this, let XLA fuse the reduction


# ----------------------------------------------------------------------------
# Per-element GAN loss term (static config baked in; f32 in / f32 out)
# ----------------------------------------------------------------------------
def _elementwise_loss(x, gan_type, target_is_real, target_val):
    if gan_type in ("gan", "ragan"):
        # BCEWithLogitsLoss vs constant target t (stable formulation):
        #   max(x, 0) - x*t + log1p(exp(-|x|))
        elem = jnp.maximum(x, 0.0) + jnp.log1p(jnp.exp(-jnp.abs(x)))
        t = float(target_val)
        if t == 1.0:
            elem = elem - x
        elif t != 0.0:                      # skip the x*0 multiply for fake label
            elem = elem - x * jnp.float32(t)
        return elem
    if gan_type == "lsgan":
        t = float(target_val)
        d = x if t == 0.0 else x - jnp.float32(t)
        return d * d
    if gan_type == "wgan":
        return -x if target_is_real else x
    if gan_type == "softplusgan":
        z = -x if target_is_real else x
        return jnp.maximum(z, 0.0) + jnp.log1p(jnp.exp(-jnp.abs(z)))  # softplus(z)
    raise NotImplementedError(gan_type)


# ----------------------------------------------------------------------------
# Pallas kernel: per-core (8, 128) partial sums of the elementwise loss
# ----------------------------------------------------------------------------
def _gan_partial_sum_kernel(x_ref, o_ref, *, gan_type, target_is_real, target_val,
                            total_n, block_rows, steps_per_core):
    c = pl.program_id(0)      # core / partial-sum index ("parallel")
    i = pl.program_id(1)      # reduction step within this core ("arbitrary")

    @pl.when(i == 0)
    def _init():
        o_ref[...] = jnp.zeros_like(o_ref)

    x = x_ref[...].astype(jnp.float32)                       # (block_rows, 128)
    elem = _elementwise_loss(x, gan_type, target_is_real, target_val)

    # Logical (unclamped) block index and flat offset of its first element.
    blk = c * steps_per_core + i
    start = blk * (block_rows * LANES)
    needs_mask = start + block_rows * LANES > total_n         # tail / overrun blocks only

    @pl.when(jnp.logical_not(needs_mask))
    def _accumulate_full():
        # Pure VALU accumulation into the resident (8, 128) output block.
        o_ref[...] += elem.reshape(-1, SUBLANES, LANES).sum(axis=0)

    @pl.when(needs_mask)
    def _accumulate_tail():
        # Pallas leaves the region past the valid rows of a partial block
        # undefined (and logically-overrun blocks re-read clamped data), so a
        # select-based mask against the flat element index is required here.
        row = jax.lax.broadcasted_iota(jnp.int32, elem.shape, 0)
        lane = jax.lax.broadcasted_iota(jnp.int32, elem.shape, 1)
        flat = start + row * LANES + lane
        masked = jnp.where(flat < total_n, elem, 0.0)
        o_ref[...] += masked.reshape(-1, SUBLANES, LANES).sum(axis=0)


# ----------------------------------------------------------------------------
# Wrapper: (rows, 128) slab -> per-core partial sums -> mean in XLA
# ----------------------------------------------------------------------------
def _gan_loss_mean_pallas(x, *, gan_type, target_is_real, target_val):
    n = int(x.size)
    itemsize = jnp.dtype(x.dtype).itemsize

    flat = x.reshape(-1)
    lane_pad = (-n) % LANES
    if lane_pad:
        # TODO(synk): special-case the <128-element lane tail instead of padding
        # (jnp.pad copies the whole array when n % 128 != 0; zeros are masked in-kernel).
        flat = jnp.pad(flat, (0, lane_pad))
    rows = flat.shape[0] // LANES
    x2 = flat.reshape(rows, LANES)

    # Block rows: ~TARGET_BLOCK_BYTES per input block (double-buffered), never
    # exceeding the valid row count (rows >= 8 is guaranteed by the caller).
    br_cap = max(SUBLANES,
                 (TARGET_BLOCK_BYTES // (LANES * itemsize)) // SUBLANES * SUBLANES)
    br = min(br_cap, (rows // SUBLANES) * SUBLANES)

    steps_total = -(-rows // br)                       # cdiv
    steps_per_core = -(-steps_total // NUM_CORES)      # cdiv
    last_blk = steps_total - 1

    kernel = functools.partial(
        _gan_partial_sum_kernel,
        gan_type=gan_type, target_is_real=target_is_real, target_val=target_val,
        total_n=n, block_rows=br, steps_per_core=steps_per_core)

    flops_per = {"gan": 7, "ragan": 7, "lsgan": 4, "wgan": 2, "softplusgan": 6}[gan_type]
    transc_per = 2 if gan_type in ("gan", "ragan", "softplusgan") else 0
    cost = pl.CostEstimate(
        flops=flops_per * n,
        transcendentals=transc_per * n,
        bytes_accessed=n * itemsize + NUM_CORES * SUBLANES * LANES * 4)

    partials = pl.pallas_call(
        kernel,
        out_shape=jax.ShapeDtypeStruct((NUM_CORES * SUBLANES, LANES), jnp.float32),
        grid_spec=pltpu.PrefetchScalarGridSpec(
            num_scalar_prefetch=0,
            grid=(NUM_CORES, steps_per_core),
            in_specs=[pl.BlockSpec(
                (br, LANES),
                # Clamp logically-overrun block indices (odd steps_total); their
                # contribution is fully masked inside the kernel.
                lambda c, i: (jnp.minimum(c * steps_per_core + i, last_blk), 0))],
            out_specs=pl.BlockSpec((SUBLANES, LANES), lambda c, i: (c, 0)),
        ),
        compiler_params=pltpu.CompilerParams(
            dimension_semantics=("parallel", "arbitrary")),
        cost_estimate=cost,
    )(x2)

    # Tiny final reduce + mean outside the kernel (XLU work deferred once).
    return jnp.sum(partials) * jnp.float32(1.0 / n)


# ----------------------------------------------------------------------------
# GANLoss module (forward-pass semantics of the PyTorch reference)
# ----------------------------------------------------------------------------
class GANLoss:
    def __init__(self, gan_type, real_label_val=1.0, fake_label_val=0.0,
                 pallas_min_elems=PALLAS_MIN_ELEMS):
        self.gan_type = gan_type.lower()
        if self.gan_type not in ("gan", "ragan", "lsgan", "wgan", "softplusgan"):
            raise NotImplementedError(
                "GAN type [{:s}] is not found".format(self.gan_type))
        self.real_label_val = float(real_label_val)
        self.fake_label_val = float(fake_label_val)
        self.pallas_min_elems = int(pallas_min_elems)

    def __call__(self, input, target_is_real):
        # target_is_real / gan_type are static Python config (as in the module);
        # the target-tensor fill + loss + mean are fused into one Pallas kernel.
        target_is_real = bool(target_is_real)
        target_val = self.real_label_val if target_is_real else self.fake_label_val
        n = int(input.size)
        if n < max(self.pallas_min_elems, SUBLANES * LANES):
            # Tiny inputs: fixed pallas_call overhead dominates; let XLA fuse it.
            x = input.astype(jnp.float32)
            return jnp.mean(
                _elementwise_loss(x, self.gan_type, target_is_real, target_val))
        return _gan_loss_mean_pallas(
            input, gan_type=self.gan_type,
            target_is_real=target_is_real, target_val=target_val)


# ----------------------------------------------------------------------------
# Pure-JAX reference (independent formulation, for correctness check only)
# ----------------------------------------------------------------------------
def _reference_gan_loss(x, gan_type, target_is_real, real=1.0, fake=0.0):
    x = x.astype(jnp.float32)
    if gan_type in ("gan", "ragan"):
        t = real if target_is_real else fake
        return jnp.mean(-(t * jax.nn.log_sigmoid(x)
                          + (1.0 - t) * jax.nn.log_sigmoid(-x)))
    if gan_type == "lsgan":
        t = real if target_is_real else fake
        return jnp.mean((x - t) ** 2)
    if gan_type == "wgan":
        return -jnp.mean(x) if target_is_real else jnp.mean(x)
    if gan_type == "softplusgan":
        return jnp.mean(jax.nn.softplus(-x if target_is_real else x))
    raise NotImplementedError(gan_type)


if __name__ == "__main__":
    key = jax.random.PRNGKey(0)
    x = jax.random.normal(key, (2, 4, 16, 16), jnp.float32)  # discriminator logits

    for dtype in (jnp.float32, jnp.bfloat16):
        xd = x.astype(dtype)
        for gan_type in ("gan", "ragan", "lsgan", "wgan", "softplusgan"):
            # pallas_min_elems=0 forces the Pallas path at this small demo size.
            crit = GANLoss(gan_type, real_label_val=1.0, fake_label_val=0.0,
                           pallas_min_elems=0)
            for target_is_real in (True, False):
                loss = crit(xd, target_is_real)
                loss = jax.block_until_ready(loss)
                ref = _reference_gan_loss(xd, gan_type, target_is_real)
                assert loss.shape == () and bool(jnp.isfinite(loss)), (
                    gan_type, target_is_real, str(dtype))
                assert bool(jnp.allclose(loss, ref, rtol=1e-5, atol=1e-5)), (
                    gan_type, target_is_real, str(dtype), float(loss), float(ref))

    print("KERNEL_OK")
</pallas_src>

<mosaic_0001>
module attributes {stable_mosaic.version = 11 : i64} {
  func.func @_gan_partial_sum_kernel(%arg0: i32, %arg1: i32, %arg2: memref<16x128xf32, #tpu.memory_space<vmem>>, %arg3: memref<8x128xf32, #tpu.memory_space<vmem>>) attributes {dimension_semantics = [#tpu.dimension_semantics<parallel>, #tpu.dimension_semantics<arbitrary>], iteration_bounds = array<i64: 2, 1>, scalar_prefetch = 0 : i64, scratch_operands = 0 : i64, tpu.core_type = #tpu.core_type<tc>, window_params = [{transform_indices = @transform_0, window_bounds = array<i64: 16, 128>}, {transform_indices = @transform_1, window_bounds = array<i64: 8, 128>}]} {
    %c0_i32 = arith.constant 0 : i32
    %0 = arith.cmpi eq, %arg1, %c0_i32 : i32
    %1 = arith.extui %0 : i1 to i32
    %c0_i32_0 = arith.constant 0 : i32
    %2 = arith.cmpi ne, %1, %c0_i32_0 : i32
    scf.if %2 {
      %cst_7 = arith.constant 0.000000e+00 : f32
      %23 = vector.broadcast %cst_7 : f32 to vector<8x128xf32>
      %c0_8 = arith.constant 0 : index
      %c0_9 = arith.constant 0 : index
      %24 = vector.load %arg3[%c0_8, %c0_9] : memref<8x128xf32, #tpu.memory_space<vmem>>, vector<8x128xf32>
      tpu.vector_store %arg3[%c0_8, %c0_9], %23 {strides = array<i32>} : memref<8x128xf32, #tpu.memory_space<vmem>>, vector<8x128xf32>,
    } else {
    }
    %c0 = arith.constant 0 : index
    %c0_1 = arith.constant 0 : index
    %3 = vector.load %arg2[%c0, %c0_1] : memref<16x128xf32, #tpu.memory_space<vmem>>, vector<16x128xf32>
    %cst = arith.constant 0.000000e+00 : f32
    %4 = vector.broadcast %cst : f32 to vector<16x128xf32>
    %5 = arith.maximumf %3, %4 : vector<16x128xf32>
    %6 = math.absf %3 : vector<16x128xf32>
    %cst_2 = arith.constant 0.000000e+00 : f32
    %7 = vector.broadcast %cst_2 : f32 to vector<16x128xf32>
    %8 = arith.subf %7, %6 : vector<16x128xf32>
    %9 = math.exp %8 : vector<16x128xf32>
    %10 = math.log1p %9 : vector<16x128xf32>
    %11 = arith.addf %5, %10 : vector<16x128xf32>
    %12 = arith.subf %11, %3 : vector<16x128xf32>
    %c1_i32 = arith.constant 1 : i32
    %13 = arith.muli %arg0, %c1_i32 : i32
    %14 = arith.addi %13, %arg1 : i32
    %c2048_i32 = arith.constant 2048 : i32
    %15 = arith.muli %14, %c2048_i32 : i32
    %c2048_i32_3 = arith.constant 2048 : i32
    %16 = arith.addi %15, %c2048_i32_3 : i32
    %c2048_i32_4 = arith.constant 2048 : i32
    %17 = arith.cmpi sgt, %16, %c2048_i32_4 : i32
    %true = arith.constant true
    %18 = arith.xori %17, %true : i1
    %19 = arith.extui %18 : i1 to i32
    %c0_i32_5 = arith.constant 0 : i32
    %20 = arith.cmpi ne, %19, %c0_i32_5 : i32
    scf.if %20 {
      %c0_7 = arith.constant 0 : index
      %c0_8 = arith.constant 0 : index
      %23 = vector.load %arg3[%c0_7, %c0_8] : memref<8x128xf32, #tpu.memory_space<vmem>>, vector<8x128xf32>
      %24 = vector.shape_cast %12 : vector<16x128xf32> to vector<2x8x128xf32>
      %cst_9 = arith.constant dense<0.000000e+00> : vector<8x128xf32>
      %25 = vector.multi_reduction <add>, %24, %cst_9 [0] : vector<2x8x128xf32> to vector<8x128xf32>
      %26 = arith.addf %23, %25 : vector<8x128xf32>
      %c0_10 = arith.constant 0 : index
      %c0_11 = arith.constant 0 : index
      %27 = vector.load %arg3[%c0_10, %c0_11] : memref<8x128xf32, #tpu.memory_space<vmem>>, vector<8x128xf32>
      tpu.vector_store %arg3[%c0_10, %c0_11], %26 {strides = array<i32>} : memref<8x128xf32, #tpu.memory_space<vmem>>, vector<8x128xf32>,
    } else {
    }
    %21 = arith.extui %17 : i1 to i32
    %c0_i32_6 = arith.constant 0 : i32
    %22 = arith.cmpi ne, %21, %c0_i32_6 : i32
    scf.if %22 {
      %23 = tpu.iota {dimensions = array<i32: 0>} : vector<16x128xi32>
      %24 = tpu.iota {dimensions = array<i32: 1>} : vector<16x128xi32>
      %c128_i32 = arith.constant 128 : i32
      %25 = vector.broadcast %c128_i32 : i32 to vector<16x128xi32>
      %26 = arith.muli %23, %25 : vector<16x128xi32>
      %27 = vector.broadcast %15 : i32 to vector<16x128xi32>
      %28 = arith.addi %27, %26 : vector<16x128xi32>
      %29 = arith.addi %28, %24 : vector<16x128xi32>
      %c2048_i32_7 = arith.constant 2048 : i32
      %30 = vector.broadcast %c2048_i32_7 : i32 to vector<16x128xi32>
      %31 = arith.cmpi slt, %29, %30 : vector<16x128xi32>
      %cst_8 = arith.constant 0.000000e+00 : f32
      %32 = vector.broadcast %cst_8 : f32 to vector<16x128xf32>
      %33 = arith.select %31, %12, %32 : vector<16x128xi1>, vector<16x128xf32>
      %c0_9 = arith.constant 0 : index
      %c0_10 = arith.constant 0 : index
      %34 = vector.load %arg3[%c0_9, %c0_10] : memref<8x128xf32, #tpu.memory_space<vmem>>, vector<8x128xf32>
      %35 = vector.shape_cast %33 : vector<16x128xf32> to vector<2x8x128xf32>
      %cst_11 = arith.constant dense<0.000000e+00> : vector<8x128xf32>
      %36 = vector.multi_reduction <add>, %35, %cst_11 [0] : vector<2x8x128xf32> to vector<8x128xf32>
      %37 = arith.addf %34, %36 : vector<8x128xf32>
      %c0_12 = arith.constant 0 : index
      %c0_13 = arith.constant 0 : index
      %38 = vector.load %arg3[%c0_12, %c0_13] : memref<8x128xf32, #tpu.memory_space<vmem>>, vector<8x128xf32>
      tpu.vector_store %arg3[%c0_12, %c0_13], %37 {strides = array<i32>} : memref<8x128xf32, #tpu.memory_space<vmem>>, vector<8x128xf32>,
    } else {
    }
    return
  }
  func.func @transform_0(%arg0: i32, %arg1: i32) -> (i32, i32) {
    %c1_i32 = arith.constant 1 : i32
    %0 = arith.muli %arg0, %c1_i32 : i32
    %1 = arith.addi %0, %arg1 : i32
    %c0_i32 = arith.constant 0 : i32
    %2 = arith.minsi %1, %c0_i32 : i32
    %c0_i32_0 = arith.constant 0 : i32
    %c0_i32_1 = arith.constant 0 : i32
    return %2, %c0_i32_0 : i32, i32
  }
  func.func @transform_1(%arg0: i32, %arg1: i32) -> (i32, i32) {
    %c0_i32 = arith.constant 0 : i32
    %c0_i32_0 = arith.constant 0 : i32
    return %arg0, %c0_i32 : i32, i32
  }
}

</mosaic_0001>

<bundles_post_ra>
// kernel: tpu_custom_call.1
= control target key start
LH: loop header
LB: loop body
LE: loop exit
PB: predicated region body
PF: predicated region fallthrough
CT: control target
= control target key end

     0   :  { %6 = vsyncpa [#allocation3], 0  ;;  %s759_s0 = inlined_call_operand.hbm [shape: f32[16,128], index: 0, kind: input, shape index: {}]   ;;  %s760_s1 = inlined_call_operand.hbm [shape: f32[16,128], index: 1, kind: output, shape index: {}]  }
   0x1   :  { %8 = vsyncpa [#allocation3 + $0x1], 0 }
   0x2   :  { %9 = vsyncpa [#allocation4], 0 }
   0x3   :  { %11 = vsyncpa [#allocation4 + $0x1], 0  ;;  %s594_s6 = smov 0   ;;  %s596_s7 = smov 0  }
   0x4   :  { %s598_s8 = smov 0   ;;  %s600_s9 = smov 0  }
   0x5   :  { %s602_s10 = smov 0   ;;  %s604_s11 = smov 0  }
   0x6   :  { %s606_s12 = smov 0   ;;  %s608_s13 = smov 0  }
   0x7 LB: > { %s330_s14 = sadd.s32 4294967295, %s578_s13   ;;  %s331_s15 = sadd.s32 4294967294, %s578_s13   ;;  %s578_s13 = sphi %s608_s13, %s17_s13   ;;  %s574_s12 = sphi %s606_s12, %s771_s12   ;;  %s570_s11 = sphi %s604_s11, %s770_s11   ;;  %s566_s10 = sphi %s602_s10, %s749_s10   ;;  %s562_s9 = sphi %s600_s9, %s769_s9   ;;  %s558_s8 = sphi %s598_s8, %s768_s8   ;;  %s554_s7 = sphi %s596_s7, %s767_s7   ;;  %s550_s6 = sphi %s594_s6, %s766_s6  }
   0x8   : > { %s29_s16 = sadd.s32 1, %s574_s12  ;;  %p547_p1 = scmp.ne.s32.totalorder %s566_s10, 0 }
   0x9   : > { %p31_p0 = scmp.ge.s32.totalorder %s29_s16, 2  ;;  %p50_p2 = scmp.eq.s32.totalorder %s578_s13, 0 }
   0xa   : > { %p55_p3 = scmp.ne.s32.totalorder %s566_s10, %s562_s9  ;;  %p56_p5 = scmp.eq.s32.totalorder %s330_s14, 0 }
   0xb   : > { %s773_s16 = smov (%p31_p0, %s29_s16), 0  ;;  %p640_p4 = por %p547_p1, %p50_p2 }
   0xc   : > { %p644_p6 = por %p56_p5, %p55_p3  ;;  %s65_s19 = ssub.s32 %s574_s12, %s773_s16 }
   0xd   : > { %p66_p7 = scmp.eq.s32.totalorder %s65_s19, 0  ;;  %s68_s20 = sadd.s32 1, %s558_s8 }
   0xe   : > { %p78_p8 = scmp.ne.s32.totalorder %s558_s8, %s554_s7  ;;  %p79_p9 = scmp.eq.s32.totalorder %s330_s14, 1 }
   0xf   : > { %s652_s21 = scalar_select %p66_p7, %s558_s8, %s68_s20  }
  0x10   : > { %p84_p10 = scmp.ne.s32.totalorder %s554_s7, %s550_s6  ;;  %p85_p11 = scmp.eq.s32.totalorder %s331_s15, 1 }
  0x11   : > { %p658_p12 = por %p79_p9, %p78_p8  ;;  %p333_p13 = scmp.ge.s32.totalorder %s578_s13, 2 }
  0x12   : > { %p663_p0 = por %p85_p11, %p84_p10  ;;  %p360_p1 = scmp.lt.s32.totalorder %s578_s13, 2 }
  0x13   : > { %s118_s26 = sshll.u32 %s759_s0, 4  ;;  %s580_s27 = smov [#allocation2]   ;;  %s119_s26 = int_to_ptr.hbm [resolvable:$true] %s118_s26 }
  0x14   : > { %s120_s28 = sshll.u32 %s580_s27, 4  ;;  %p673_p2 = pnand %p360_p1, %p640_p4  ;;  %s121_s28 = int_to_ptr.vmem [resolvable:$true] %s120_s28 }
  0x15   : > { %p337_p3 = scmp.ge.s32.totalorder %s578_s13, 1  ;;  %p128_p5 = scmp.lt.s32.totalorder %s578_s13, 3 }
  0x16   : > { %s445_s30 = sshra.s32 %s119_s26, 4  ;;  %p449_p8 = pneg %p673_p2  ;;  %s446_s30 = int_to_ptr.hbm [resolvable:$true] %s445_s30 }
  0x17   : > { %s447_s2 = scalar_lea.hbm %s446_s30, 16  ;;  %s452_s5 = scalar_lea.hbm %s759_s0, 16 }
  0x18   : > { %p448_p7 = scmp.ne.s32.totalorder %s446_s30, %s447_s2  ;;  %p454_p11 = scmp.lt.s32.totalorder %s452_s5, %s447_s2 }
  0x1a   : > { %p450_p9 = pnand %p449_p8, %p448_p7 }
  0x1c   : > { %p451_p10 = pneg %p450_p9 }
  0x1e   : > { %p456_p4 = pnand %p454_p11, %p451_p10 }
  0x20   : > { %459 = shalt.err (!%p456_p4)
}
  0x21   : > { %s581_s9 = smov 128   ;;  %s582_s14 = smov 8  }
  0x22   : > { %355 = dma.hbm_to_vmem [thread:$0]  (!%p673_p2), %s119_s26, 256, %s121_s28, [#allocation3], %s581_s9, %s581_s9, %s582_s14  }
  0x23   : > { %p129_p1 = pnand %p337_p3, %p128_p5 }
  0x24   : > { %s134_s15 = sand.u32 (!%p129_p1), 1, %s566_s10  }
  0x25   : > { %132 = sbr.rel (%p129_p1) target bundleno = 120 (0x78), region = 24  ;;  %s338_s17 = sshll.u32 (!%p129_p1), %s134_s15, 4 }
  0x26   : > { %s135_s19 = scalar_lea.sflag (!%p129_p1), [#allocation3], %s134_s15  ;;  %s138_s20 = scalar_lea.vmem (!%p129_p1), [#allocation2], %s338_s17 }
  0x2a   : > { %540 = dma.done.wait (%p644_p6), %s135_s19, 256  }
  0x2b   : > { %542 = vsyncadd (%p644_p6), %s135_s19, 4294967040  ;;  %s155_s24 = sand.u32 1, %s554_s7   ;;  %s340_s25 = sshll.u32 %s570_s11, 11  ;;  %v583_v0 = vmov 0.0   ;;  %v167_v1 = vld [vmem:[%s138_s20] sm:$0xff]  ;;  %v168_v2 = vld [vmem:[%s138_s20 + $0x8] sm:$0xff] }
  0x2c   : > { %s339_s26 = sshll.u32 %s155_s24, 3  ;;  %s701_s27 = sadd.s32 2048, %s340_s25  ;;  %v171_v3 = vand.u32 2147483647, %v167_v1  ;;  %v172_v4 = vand.u32 2147483647, %v168_v2 }
  0x2d   : > { %s703_s28 = scalar_lea.vmem [#allocation5], %s339_s26  ;;  %v169_v21 = vmax.f32 %v167_v1, 0.0  ;;  %v170_v24 = vmax.f32 %v168_v2, 0.0  ;;  %p341_p6 = scmp.gt.s32.totalorder %s701_s27, 2048 }
  0x2e   : > { %166 = vst [vmem:[%s703_s28] sm:$0xff] %v583_v0  ;;  %v173_v5 = vsub.f32 0.0, %v171_v3  ;;  %v174_v6 = vsub.f32 0.0, %v172_v4 }
  0x30   : > { %v175_v7 = vmul.f32 1.442695, %v173_v5  ;;  %v177_v8 = vmul.f32 1.442695, %v174_v6 }
  0x32   : > { %437 = vpow2.f32 %v175_v7 }
  0x33   : > { %439 = vpow2.f32 %v177_v8 }
  0x38   : > { %v438_v9 = vpop.eup %437 }
  0x39   : > { %v440_v10 = vpop.eup %439  ;;  %v179_v11 = vadd.f32 1.0, %v438_v9  ;;  %v182_v12 = vmul.f32 -0.5, %v438_v9  ;;  %v185_v16 = vand.u32 2147483647, %v438_v9 }
  0x3a   : > { %v188_v13 = vadd.f32 1.0, %v440_v10  ;;  %v191_v14 = vmul.f32 -0.5, %v440_v10  ;;  %v194_v18 = vand.u32 2147483647, %v440_v10 }
  0x3b   : > { %441 = vlog2.f32 %v179_v11  ;;  %v183_v15 = vadd.f32 1.0, %v182_v12  ;;  %vm186_vm0 = vcmp.lt.f32.partialorder %v185_v16, 0.0004427343 }
  0x3c   : > { %443 = vlog2.f32 %v188_v13  ;;  %v192_v17 = vadd.f32 1.0, %v191_v14  ;;  %vm195_vm1 = vcmp.lt.f32.partialorder %v194_v18, 0.0004427343 }
  0x3d   : > { %v184_v19 = vmul.f32 %v438_v9, %v183_v15 }
  0x3e   : > { %v193_v22 = vmul.f32 %v440_v10, %v192_v17 }
  0x41   : > { %v442_v20 = vpop.eup %441 }
  0x42   : > { %v444_v23 = vpop.eup %443  ;;  %v181_v25 = vmul.f32 0.6931472, %v442_v20 }
  0x43   : > { %v190_v26 = vmul.f32 0.6931472, %v444_v23 }
  0x44   : > { %v187_v27 = vsel %vm186_vm0, %v184_v19, %v181_v25  ;;  %208 = sbr.rel (%p341_p6) target bundleno = 79 (0x4f), region = 36 }
  0x45   : > { %v196_v28 = vsel %vm195_vm1, %v193_v22, %v190_v26  ;;  %v197_v29 = vadd.f32 %v187_v27, %v169_v21 }
  0x46   : > { %v198_v30 = vadd.f32 %v196_v28, %v170_v24 }
  0x47   : > { %v199_v31 = vsub.f32 %v197_v29, %v167_v1 }
  0x48   : > { %v200_v32 = vsub.f32 %v198_v30, %v168_v2 }
  0x49   : > { %v209_v33 = vld [vmem:[%s703_s28] sm:$0xff] }
  0x4a   : > { %v210_v34 = vadd.f32 %v200_v32, %v199_v31 }
  0x4c   : > { %v211_v35 = vadd.f32 %v210_v34, %v209_v33 }
  0x4e   : > { %212 = vst [vmem:[%s703_s28] sm:$0xff] %v211_v35 }
  0x4f PF: > { %p342_p2 = scmp.le.s32.totalorder %s701_s27, 2048 }
  0x51   : > { %215 = sbr.rel (%p342_p2) target bundleno = 105 (0x69), region = 40 }
  0x56   : > { %v216_v36 = vlaneseq  ;;  %v223_v38 = vstv %s340_s25  ;;  %v232_v49 = vld [vmem:[%s703_s28] sm:$0xff] }
  0x58   : > { %v217_v37 = vshrl.u32 %v216_v36, 7  ;;  %v220_v40 = vand.u32 127, %v216_v36 }
  0x5a   : > { %v218_v39 = vadd.s32 8, %v217_v37  ;;  %v221_v41 = vmul.u32 128, %v217_v37 }
  0x5c   : > { %v222_v42 = vmul.u32 128, %v218_v39  ;;  %v224_v43 = vadd.s32 %v223_v38, %v221_v41 }
  0x5e   : > { %v225_v44 = vadd.s32 %v223_v38, %v222_v42  ;;  %v226_v45 = vadd.s32 %v224_v43, %v220_v40 }
  0x60   : > { %v227_v46 = vadd.s32 %v225_v44, %v220_v40  ;;  %vm228_vm2 = vcmp.lt.s32.totalorder %v226_v45, 2048 }
  0x61   : > { %v230_v47 = vsel %vm228_vm2, %v199_v31, 0.0 }
  0x62   : > { %vm229_vm3 = vcmp.lt.s32.totalorder %v227_v46, 2048 }
  0x63   : > { %v231_v48 = vsel %vm229_vm3, %v200_v32, 0.0 }
  0x64   : > { %v233_v50 = vadd.f32 %v231_v48, %v230_v47 }
  0x66   : > { %v234_v51 = vadd.f32 %v233_v50, %v232_v49 }
  0x68   : > { %235 = vst [vmem:[%s703_s28] sm:$0xff] %v234_v51 }
  0x69 PF: > { %s344_s18 = sshll.u32 %s570_s11, 3  ;;  %s249_s3 = sshll.u32 %s703_s28, 4  ;;  %s250_s3 = int_to_ptr.vmem [resolvable:$true] %s249_s3 }
  0x6a   : > { %s247_s2 = scalar_lea.hbm %s760_s1, %s344_s18  ;;  %s237_s5 = scalar_lea.sflag [#allocation4], %s155_s24 }
  0x6b   : > { %s251_s4 = sshll.u32 %s247_s2, 4  ;;  %s495_s11 = scalar_lea.hbm %s760_s1, 16  ;;  %s252_s4 = int_to_ptr.hbm [resolvable:$true] %s251_s4 }
  0x6c   : > { %s489_s9 = sshra.s32 %s252_s4, 4  ;;  %s490_s9 = int_to_ptr.hbm [resolvable:$true] %s489_s9 }
  0x6d   : > { %s491_s14 = scalar_lea.hbm %s490_s9, 8  ;;  %p496_p8 = scmp.lt.s32.totalorder %s490_s9, %s760_s1 }
  0x6e   : > { %p492_p3 = scmp.ne.s32.totalorder %s490_s9, %s491_s14  ;;  %p497_p9 = scmp.lt.s32.totalorder %s495_s11, %s491_s14 }
  0x70   : > { %p493_p5 = pnand %p492_p3, %p658_p12  ;;  %p498_p10 = por %p497_p9, %p496_p8 }
  0x72   : > { %p494_p7 = pneg %p493_p5 }
  0x74   : > { %p499_p11 = pnand %p498_p10, %p494_p7 }
  0x76   : > { %502 = shalt.err (!%p499_p11)
}
  0x77   : > { %350 = dma.vmem_to_hbm [thread:$0]  (%p658_p12), %s250_s3, 128, %s252_s4, %s237_s5  }
  0x78 PF: > { %s263_s24 = sand.u32 1, %s550_s6   ;;  %p357_p4 = pnand %p333_p13, %p663_p0 }
  0x79   : > { %s264_s25 = scalar_lea.sflag [#allocation4], %s263_s24 }
  0x7a   : > { %p358_p1 = pneg %p357_p4 }
  0x7c   : > { %544 = dma.done.wait (%p358_p1), %s264_s25, 128  }
  0x7d   : > { %546 = vsyncadd (%p358_p1), %s264_s25, 4294967168  ;;  %s17_s13 = sadd.s32 1, %s578_s13   ;;  %s766_s6 = smov %s554_s7 }
  0x7e   : > { %p14_p6 = scmp.ge.s32.totalorder %s17_s13, 4   ;;  %s767_s7 = smov %s558_s8 }
  0x7f   : > { %s768_s8 = smov %s652_s21  ;;  %s769_s9 = smov %s566_s10 }
  0x80   : > { %s749_s10 = smov 0   ;;  %s770_s11 = smov %s574_s12 }
  0x81   : > { %s771_s12 = smov %s773_s16  ;;  %16 = sbr.rel (!%p14_p6) target bundleno = 7 (0x7), region = 81 }
  0x86   :  { %270 = vsyncpa [#allocation3], 1 }
  0x87   :  { %272 = vsyncpa [#allocation3 + $0x1], 1 }
  0x88   :  { %273 = vsyncpa [#allocation4], 1 }
  0x89   :  { %275 = vsyncpa [#allocation4 + $0x1], 1 }

</bundles_post_ra>
